<compile_context>
chip_gen: v7x
topology: tpu7x:2x2x1
jax: 0.10.0
libtpu: 0.0.40
codegen_flags: <defaults>
</compile_context>

<pallas_src>
import functools

import jax
import jax.numpy as jnp
from jax import lax
from jax.experimental import pallas as pl
from jax.experimental.pallas import tpu as pltpu

LN_EPS = 1e-5          # torch.nn.LayerNorm default
_MIN_GRID_STEPS = 4    # keep >=2 (ideally 4+) grid steps so v7x's 2 TCs share work


def _round_up(x, m):
    return ((x + m - 1) // m) * m


def _clip_proj_kernel(x_ref, w_ref, b_ref, o_ref, *, exact_ln):
    # x_ref: (TM, D_in)     tile of embeddings (last tile may be partial/masked)
    # w_ref: (D_in, D_out)  folded weight (gamma * W)^T, bf16 (or f32)
    # b_ref: (1, D_out)     folded bias (W @ beta + b), f32
    # o_ref: (TM, D_out)    output tile
    x = x_ref[...].astype(jnp.float32)

    if exact_ln:
        # Two-pass (centered) variance: bit-faithful path for mxu_dtype=f32.
        mean = jnp.mean(x, axis=-1, keepdims=True)
        centered = x - mean
        var = jnp.mean(centered * centered, axis=-1, keepdims=True)
        xn = centered * lax.rsqrt(var + LN_EPS)
    else:
        # Single-pass variance E[x^2] - mean^2: fewer VPU passes over the tile.
        mean = jnp.mean(x, axis=-1, keepdims=True)
        msq = jnp.mean(x * x, axis=-1, keepdims=True)
        var = jnp.maximum(msq - mean * mean, 0.0)
        xn = (x - mean) * lax.rsqrt(var + LN_EPS)

    # Canonical [M,K]x[K,N] MXU matmul with f32 accumulation.
    w = w_ref[...]
    out = jnp.dot(xn.astype(w.dtype), w, preferred_element_type=jnp.float32)
    o_ref[...] = (out + b_ref[...]).astype(o_ref.dtype)


@functools.partial(jax.jit, static_argnames=("tm", "mxu_dtype"))
def clip_feature_processor(embedding, gamma, beta, weight, bias, *,
                           tm=512, mxu_dtype=jnp.bfloat16):
    """Fused LayerNorm(D_in) -> Linear(D_in, D_out).

    embedding: [B, D_in] (f32 or bf16 — dtype passes through to the output)
    gamma/beta: [D_in] LayerNorm affine;  weight: [D_out, D_in] (PyTorch layout);
    bias: [D_out].

    NOTE: with the default mxu_dtype=bfloat16 the matmul operands are bf16
    (f32 accumulation), so results deviate slightly from a pure-f32 torch
    reference.  Pass mxu_dtype=jnp.float32 for bit-faithful f32 semantics.
    Folding gamma into W happens BEFORE the mxu_dtype cast, so quantization
    error scales with gamma*W (fine for gamma ~ 1).
    """
    B, D_in = embedding.shape
    D_out, D_in_w = weight.shape
    assert D_in_w == D_in

    # ---- Fold the LayerNorm affine into the linear layer (exact) ------------
    gamma_f = gamma.astype(jnp.float32)
    beta_f = beta.astype(jnp.float32)
    w_f32 = weight.astype(jnp.float32)                              # [D_out, D_in]
    w_folded = (w_f32 * gamma_f[None, :]).T.astype(mxu_dtype)       # [D_in, D_out]
    b_folded = (w_f32 @ beta_f + bias.astype(jnp.float32)).reshape(1, D_out)

    # ---- Tile selection (no batch padding) -----------------------------------
    # Minimum sublane multiple for the input dtype (f32:8, bf16:16, int8/fp8:32).
    sublane = {4: 8, 2: 16, 1: 32}.get(jnp.dtype(embedding.dtype).itemsize, 8)
    # Cap the tile so the grid has >= _MIN_GRID_STEPS steps when B allows it
    # (keeps both v7x TensorCores busy); never below one sublane group.
    tm_balanced = _round_up(max(1, -(-B // _MIN_GRID_STEPS)), sublane)
    tm_sel = max(sublane, min(_round_up(int(tm), sublane), tm_balanced))
    grid = (pl.cdiv(B, tm_sel),)   # partial trailing block handled by Pallas masking

    exact_ln = jnp.dtype(mxu_dtype) == jnp.dtype(jnp.float32)
    kernel = functools.partial(_clip_proj_kernel, exact_ln=exact_ln)

    return pl.pallas_call(
        kernel,
        out_shape=jax.ShapeDtypeStruct((B, D_out), embedding.dtype),
        grid_spec=pltpu.PrefetchScalarGridSpec(
            num_scalar_prefetch=0,
            grid=grid,
            in_specs=[
                pl.BlockSpec((tm_sel, D_in), lambda i: (i, 0)),    # x tile
                pl.BlockSpec((D_in, D_out), lambda i: (0, 0)),     # folded W (invariant)
                pl.BlockSpec((1, D_out), lambda i: (0, 0)),        # folded bias (invariant)
            ],
            out_specs=pl.BlockSpec((tm_sel, D_out), lambda i: (i, 0)),
        ),
        compiler_params=pltpu.CompilerParams(
            # Batch axis is embarrassingly parallel; on v7x this lets the two
            # TensorCores split the grid steps.
            dimension_semantics=("parallel",)),
    )(embedding, w_folded, b_folded)


def _reference(embedding, gamma, beta, weight, bias):
    x = embedding.astype(jnp.float32)
    mean = jnp.mean(x, axis=-1, keepdims=True)
    var = jnp.mean((x - mean) ** 2, axis=-1, keepdims=True)
    xn = (x - mean) / jnp.sqrt(var + LN_EPS)
    y = xn * gamma + beta
    return y @ weight.T.astype(jnp.float32) + bias


if __name__ == "__main__":
    input_dim, output_dim = 512, 128   # module defaults
    key = jax.random.PRNGKey(0)
    k_x, k_w, k_b, k_g, k_bt = jax.random.split(key, 5)

    # Deterministic synthetic parameters (shapes match nn.LayerNorm / nn.Linear).
    ln_gamma = 1.0 + 0.01 * jax.random.normal(k_g, (input_dim,), jnp.float32)
    ln_beta = 0.01 * jax.random.normal(k_bt, (input_dim,), jnp.float32)
    lin_weight = jax.random.normal(k_w, (output_dim, input_dim),
                                   jnp.float32) * (input_dim ** -0.5)
    lin_bias = 0.01 * jax.random.normal(k_b, (output_dim,), jnp.float32)

    for batch in (16, 13):   # divisible and ragged batch (exercises the partial block)
        emb = jax.random.normal(jax.random.fold_in(k_x, batch),
                                (batch, input_dim), jnp.float32)
        ref = _reference(emb, ln_gamma, ln_beta, lin_weight, lin_bias)

        # Default fast path: bf16 MXU operands, single-pass variance.
        out = clip_feature_processor(emb, ln_gamma, ln_beta, lin_weight, lin_bias)
        out = jax.block_until_ready(out)
        assert out.shape == (batch, output_dim)
        max_err = float(jnp.max(jnp.abs(out - ref)))
        assert jnp.allclose(out, ref, atol=5e-2, rtol=5e-2), (
            f"bf16 path mismatch (batch={batch}, max err={max_err})")

        # Exact-parity path: f32 MXU operands, two-pass variance.
        out_f32 = clip_feature_processor(emb, ln_gamma, ln_beta, lin_weight,
                                         lin_bias, mxu_dtype=jnp.float32)
        out_f32 = jax.block_until_ready(out_f32)
        max_err32 = float(jnp.max(jnp.abs(out_f32 - ref)))
        assert jnp.allclose(out_f32, ref, atol=2e-4, rtol=2e-4), (
            f"f32 path mismatch (batch={batch}, max err={max_err32})")

    print("KERNEL_OK")
</pallas_src>

<mosaic_0001>
module attributes {stable_mosaic.version = 11 : i64} {
  func.func @_clip_proj_kernel(%arg0: i32, %arg1: memref<8x512xf32, #tpu.memory_space<vmem>>, %arg2: memref<512x128xbf16, #tpu.memory_space<vmem>>, %arg3: memref<1x128xf32, #tpu.memory_space<vmem>>, %arg4: memref<8x128xf32, #tpu.memory_space<vmem>>) attributes {dimension_semantics = [#tpu.dimension_semantics<parallel>], iteration_bounds = array<i64: 2>, scalar_prefetch = 0 : i64, scratch_operands = 0 : i64, tpu.core_type = #tpu.core_type<tc>, window_params = [{transform_indices = @transform_0, window_bounds = array<i64: 8, 512>}, {pipeline_mode = #tpu.pipeline_mode<synchronous>, transform_indices = @transform_1, window_bounds = array<i64: 512, 128>}, {pipeline_mode = #tpu.pipeline_mode<synchronous>, transform_indices = @transform_2, window_bounds = array<i64: 1, 128>}, {transform_indices = @transform_3, window_bounds = array<i64: 8, 128>}]} {
    %c0 = arith.constant 0 : index
    %c0_0 = arith.constant 0 : index
    %0 = vector.load %arg1[%c0, %c0_0] : memref<8x512xf32, #tpu.memory_space<vmem>>, vector<8x512xf32>
    %cst = arith.constant dense<0.000000e+00> : vector<8xf32>
    %1 = vector.multi_reduction <add>, %0, %cst [1] : vector<8x512xf32> to vector<8xf32>
    %2 = vector.shape_cast %1 : vector<8xf32> to vector<8x1xf32>
    %cst_1 = arith.constant 5.120000e+02 : f32
    %3 = vector.broadcast %cst_1 : f32 to vector<8x1xf32>
    %4 = arith.divf %2, %3 : vector<8x1xf32>
    %5 = arith.mulf %0, %0 : vector<8x512xf32>
    %cst_2 = arith.constant dense<0.000000e+00> : vector<8xf32>
    %6 = vector.multi_reduction <add>, %5, %cst_2 [1] : vector<8x512xf32> to vector<8xf32>
    %7 = vector.shape_cast %6 : vector<8xf32> to vector<8x1xf32>
    %cst_3 = arith.constant 5.120000e+02 : f32
    %8 = vector.broadcast %cst_3 : f32 to vector<8x1xf32>
    %9 = arith.divf %7, %8 : vector<8x1xf32>
    %10 = arith.mulf %4, %4 : vector<8x1xf32>
    %11 = arith.subf %9, %10 : vector<8x1xf32>
    %cst_4 = arith.constant 0.000000e+00 : f32
    %12 = vector.broadcast %cst_4 : f32 to vector<8x1xf32>
    %13 = arith.maximumf %11, %12 : vector<8x1xf32>
    %14 = vector.broadcast %4 : vector<8x1xf32> to vector<8x512xf32>
    %15 = arith.subf %0, %14 : vector<8x512xf32>
    %cst_5 = arith.constant 9.99999974E-6 : f32
    %16 = vector.broadcast %cst_5 : f32 to vector<8x1xf32>
    %17 = arith.addf %13, %16 : vector<8x1xf32>
    %18 = math.rsqrt %17 : vector<8x1xf32>
    %19 = vector.broadcast %18 : vector<8x1xf32> to vector<8x512xf32>
    %20 = arith.mulf %15, %19 : vector<8x512xf32>
    %c0_6 = arith.constant 0 : index
    %c0_7 = arith.constant 0 : index
    %21 = vector.load %arg2[%c0_6, %c0_7] : memref<512x128xbf16, #tpu.memory_space<vmem>>, vector<512x128xbf16>
    %22 = arith.truncf %20 : vector<8x512xf32> to vector<8x512xbf16>
    %cst_8 = arith.constant dense<0.000000e+00> : vector<8x128xf32>
    %23 = tpu.matmul %22, %21, %cst_8 {dimension_numbers = #tpu.dot_dimension_numbers<[1], [0], [0], [1], [0, 0, 1, 1], [], []>} : vector<8x512xbf16>, vector<512x128xbf16>, vector<8x128xf32> -> vector<8x128xf32>
    %c0_9 = arith.constant 0 : index
    %c0_10 = arith.constant 0 : index
    %24 = vector.load %arg3[%c0_9, %c0_10] : memref<1x128xf32, #tpu.memory_space<vmem>>, vector<1x128xf32>
    %25 = vector.broadcast %24 : vector<1x128xf32> to vector<8x128xf32>
    %26 = arith.addf %23, %25 : vector<8x128xf32>
    %c0_11 = arith.constant 0 : index
    %c0_12 = arith.constant 0 : index
    %27 = vector.load %arg4[%c0_11, %c0_12] : memref<8x128xf32, #tpu.memory_space<vmem>>, vector<8x128xf32>
    tpu.vector_store %arg4[%c0_11, %c0_12], %26 {strides = array<i32>} : memref<8x128xf32, #tpu.memory_space<vmem>>, vector<8x128xf32>,
    return
  }
  func.func @transform_0(%arg0: i32) -> (i32, i32) {
    %c0_i32 = arith.constant 0 : i32
    %c0_i32_0 = arith.constant 0 : i32
    return %arg0, %c0_i32 : i32, i32
  }
  func.func @transform_1(%arg0: i32) -> (i32, i32) {
    %c0_i32 = arith.constant 0 : i32
    %c0_i32_0 = arith.constant 0 : i32
    %c0_i32_1 = arith.constant 0 : i32
    return %c0_i32, %c0_i32_0 : i32, i32
  }
  func.func @transform_2(%arg0: i32) -> (i32, i32) {
    %c0_i32 = arith.constant 0 : i32
    %c0_i32_0 = arith.constant 0 : i32
    %c0_i32_1 = arith.constant 0 : i32
    return %c0_i32, %c0_i32_0 : i32, i32
  }
  func.func @transform_3(%arg0: i32) -> (i32, i32) {
    %c0_i32 = arith.constant 0 : i32
    %c0_i32_0 = arith.constant 0 : i32
    return %arg0, %c0_i32 : i32, i32
  }
}

</mosaic_0001>

<bundles_post_ra>
// kernel: clip_feature_processor.1
= control target key start
LH: loop header
LB: loop body
LE: loop exit
PB: predicated region body
PF: predicated region fallthrough
CT: control target
= control target key end

     0   :  { %8 = vsyncpa [#allocation3], 0  ;;  %s1095_s0 = inlined_call_operand.vmem [shape: f32[16,512], index: 0, kind: input, shape index: {}]   ;;  %s1096_s1 = inlined_call_operand.vmem [shape: bf16[512,128], index: 1, kind: input, shape index: {}]   ;;  %s1097_s2 = inlined_call_operand.vmem [shape: f32[1,128], index: 2, kind: input, shape index: {}]   ;;  %s1098_s3 = inlined_call_operand.hbm [shape: f32[16,128], index: 3, kind: output, shape index: {}]  }
   0x1   :  { %10 = vsyncpa [#allocation3 + $0x1], 0  ;;  %s872_s12 = smov 0   ;;  %s874_s13 = smov 0  }
   0x2   :  { %s876_s14 = smov 0   ;;  %s878_s15 = smov 0  }
   0x3 LB: > { %s893_s16 = sadd.s32 4294967295, %s849_s15   ;;  %s625_s17 = sadd.s32 4294967294, %s849_s15   ;;  %s849_s15 = sphi %s878_s15, %s1104_s15   ;;  %s845_s14 = sphi %s876_s14, %s1103_s14   ;;  %s841_s13 = sphi %s874_s13, %s1102_s13   ;;  %s837_s12 = sphi %s872_s12, %s1101_s12  }
   0x4   : > { %s897_s18 = sadd.s32 1, %s849_s15   ;;  %s91_s19 = sadd.s32 1, %s845_s14 }
   0x5   : > { %s88_s20 = ssub.s32 %s849_s15, %s897_s18  ;;  %p101_p0 = scmp.ne.s32.totalorder %s845_s14, %s841_s13 }
   0x6   : > { %p89_p1 = scmp.eq.s32.totalorder %s88_s20, 0  ;;  %p102_p2 = scmp.eq.s32.totalorder %s893_s16, 1 }
   0x7   : > { %p107_p3 = scmp.ne.s32.totalorder %s841_s13, %s837_s12  ;;  %p108_p4 = scmp.eq.s32.totalorder %s625_s17, 1 }
   0x8   : > { %s908_s21 = scalar_select %p89_p1, %s845_s14, %s91_s19  }
   0x9   : > { %p910_p5 = por %p102_p2, %p101_p0  ;;  %p914_p6 = por %p108_p4, %p107_p3 }
   0xa   : > { %p628_p7 = scmp.ge.s32.totalorder %s849_s15, 1  ;;  %p140_p8 = scmp.lt.s32.totalorder %s849_s15, 3 }
   0xc   : > { %p141_p9 = pnand %p628_p7, %p140_p8 }
   0xd   : > { %p164_p10 = scmp.lt.s32.totalorder (!%p141_p9), %s893_s16, 1  ;;  %v753_v0 = vld [vmem:[%s1096_s1 + $0x40] sm:$0xff] (!%p141_p9)   ;;  %v757_v18 = vld [vmem:[%s1096_s1 + $0x48] sm:$0xff] (!%p141_p9)   ;;  %v761_v22 = vld [vmem:[%s1096_s1 + $0x50] sm:$0xff] (!%p141_p9)   ;;  %s161_s17 = sand.u32 (!%p141_p9), 1, %s841_s13  }
   0xe   : > { %144 = sbr.rel (%p141_p9) target bundleno = 435 (0x1b3), region = 32  ;;  %v754_v1 = vld [vmem:[%s1096_s1 + $0xc0] sm:$0xff] (!%p141_p9)   ;;  %670 = vmatprep.subr.bf16.mxu0 (!%p141_p9), %v753_v0  ;;  %v758_v19 = vld [vmem:[%s1096_s1 + $0xc8] sm:$0xff] (!%p141_p9)   ;;  %v762_v23 = vld [vmem:[%s1096_s1 + $0xd0] sm:$0xff] (!%p141_p9)   ;;  %s629_s19 = sshll.u32 (!%p141_p9), %s161_s17, 3 }
   0xf   : > { %v755_v2 = vld [vmem:[%s1096_s1] sm:$0xff] (!%p141_p9)   ;;  %692 = vmatprep.subr.bf16.mxu1 (!%p141_p9), %v754_v1  ;;  %v759_v20 = vld [vmem:[%s1096_s1 + $0x8] sm:$0xff] (!%p141_p9)   ;;  %v763_v24 = vld [vmem:[%s1096_s1 + $0x10] sm:$0xff] (!%p141_p9)   ;;  %s666_s25 = sshll.u32 (!%p141_p9), %s893_s16, 7  ;;  %s163_s26 = scalar_lea.vmem (!%p141_p9), [#allocation2], %s629_s19 }
  0x10   : > { %v756_v3 = vld [vmem:[%s1096_s1 + $0x80] sm:$0xff] (!%p141_p9)   ;;  %671 = vmatpush3.bf16.msra.mxu0 (!%p141_p9), %v755_v2  ;;  %v760_v21 = vld [vmem:[%s1096_s1 + $0x88] sm:$0xff] (!%p141_p9)   ;;  %v764_v25 = vld [vmem:[%s1096_s1 + $0x90] sm:$0xff] (!%p141_p9)   ;;  %s566_s27 = sshll.u32 (!%p141_p9), %s163_s26, 4  ;;  %s1053_s30 = scalar_lea.hbm (!%p141_p9), %s1098_s3, %s666_s25  ;;  %s1055_s27 = int_to_ptr.vmem [resolvable:$true] %s566_s27 }
  0x11   : > { %693 = vmatpush3.bf16.msra.mxu1 (!%p141_p9), %v756_v3  ;;  %672 = vmatprep.subr.bf16.mxu0 (!%p141_p9), %v757_v18  ;;  %v765_v26 = vld [vmem:[%s1096_s1 + $0x58] sm:$0xff] (!%p141_p9)   ;;  %v769_v30 = vld [vmem:[%s1096_s1 + $0x60] sm:$0xff] (!%p141_p9)   ;;  %v773_v34 = vld [vmem:[%s1096_s1 + $0x68] sm:$0xff] (!%p141_p9)   ;;  %s553_s4 = scalar_lea.sflag (!%p141_p9), [#allocation3], %s161_s17  ;;  %s787_s5 = scalar_lea.vmem (!%p141_p9), %s1055_s27, 128 }
  0x12   : > { %694 = vmatprep.subr.bf16.mxu1 (!%p141_p9), %v758_v19  ;;  %v766_v27 = vld [vmem:[%s1096_s1 + $0xd8] sm:$0xff] (!%p141_p9)   ;;  %v770_v31 = vld [vmem:[%s1096_s1 + $0xe0] sm:$0xff] (!%p141_p9)   ;;  %v774_v35 = vld [vmem:[%s1096_s1 + $0xe8] sm:$0xff] (!%p141_p9)   ;;  %p788_p11 = scmp.ne.s32.totalorder (!%p141_p9), %s1055_s27, %s787_s5 }
  0x13   : > { %v767_v28 = vld [vmem:[%s1096_s1 + $0x18] sm:$0xff] (!%p141_p9)   ;;  %v771_v32 = vld [vmem:[%s1096_s1 + $0x20] sm:$0xff] (!%p141_p9)   ;;  %v775_v36 = vld [vmem:[%s1096_s1 + $0x28] sm:$0xff] (!%p141_p9)  }
  0x14   : > { %673 = vmatpush3.bf16.msra.mxu0 (!%p141_p9), %v759_v20  ;;  %v768_v29 = vld [vmem:[%s1096_s1 + $0x98] sm:$0xff] (!%p141_p9)   ;;  %v772_v33 = vld [vmem:[%s1096_s1 + $0xa0] sm:$0xff] (!%p141_p9)   ;;  %v776_v37 = vld [vmem:[%s1096_s1 + $0xa8] sm:$0xff] (!%p141_p9)   ;;  %p789_p12 = pnand (!%p141_p9), %p788_p11, %p910_p5 }
  0x15   : > { %s165_s28 = scalar_select %p164_p10, %s893_s16, 1  ;;  %695 = vmatpush3.bf16.msra.mxu1 %v760_v21  ;;  %674 = vmatprep.subr.bf16.mxu0 %v761_v22  ;;  %v777_v38 = vld [vmem:[%s1096_s1 + $0x70] sm:$0xff]   ;;  %v781_v42 = vld [vmem:[%s1096_s1 + $0x78] sm:$0xff]  }
  0x16   : > { %696 = vmatprep.subr.bf16.mxu1 %v762_v23  ;;  %v778_v39 = vld [vmem:[%s1096_s1 + $0xf0] sm:$0xff]   ;;  %v782_v43 = vld [vmem:[%s1096_s1 + $0xf8] sm:$0xff]   ;;  %p790_p13 = pneg %p789_p12  ;;  %s851_s16 = smov [#allocation2]  }
  0x17   : > { %s669_s6 = sshll.u32 %s165_s28, 5  ;;  %v779_v40 = vld [vmem:[%s1096_s1 + $0x30] sm:$0xff]   ;;  %v783_v44 = vld [vmem:[%s1096_s1 + $0x38] sm:$0xff]  }
  0x18   : > { %s168_s9 = scalar_lea.vmem %s1095_s0, %s669_s6  ;;  %675 = vmatpush3.bf16.msra.mxu0 %v763_v24  ;;  %v780_v41 = vld [vmem:[%s1096_s1 + $0xb0] sm:$0xff]   ;;  %v784_v45 = vld [vmem:[%s1096_s1 + $0xb8] sm:$0xff]   ;;  %s791_s6 = sshll.u32 %s851_s16, 4  ;;  %s792_s6 = int_to_ptr.vmem [resolvable:$false] %s791_s6 }
  0x19   : > { %v937_v4 = vld [vmem:[%s168_s9] sm:$0xff]  ;;  %v939_v5 = vld [vmem:[%s168_s9 + $0x8] sm:$0xff]  ;;  %v941_v6 = vld [vmem:[%s168_s9 + $0x10] sm:$0xff]  ;;  %697 = vmatpush3.bf16.msra.mxu1 %v764_v25  ;;  %676 = vmatprep.subr.bf16.mxu0 %v765_v26  ;;  %s793_s7 = scalar_lea.vmem %s792_s6, 256  ;;  %p794_p0 = scmp.lt.s32.totalorder %s1055_s27, %s792_s6 }
  0x1a   : > { %v943_v7 = vld [vmem:[%s168_s9 + $0x18] sm:$0xff]  ;;  %v174_v8 = vadd.f32 %v939_v5, %v937_v4  ;;  %v181_v9 = vmul.f32 %v937_v4, %v937_v4  ;;  %v182_v10 = vmul.f32 %v939_v5, %v939_v5  ;;  %v183_v11 = vmul.f32 %v941_v6, %v941_v6  ;;  %698 = vmatprep.subr.bf16.mxu1 %v766_v27  ;;  %p795_p1 = scmp.lt.s32.totalorder %s793_s7, %s787_s5 }
  0x1b   : > { %v184_v13 = vmul.f32 %v943_v7, %v943_v7 }
  0x1c   : > { %v175_v12 = vadd.f32 %v174_v8, %v941_v6  ;;  %v185_v14 = vadd.f32 %v182_v10, %v181_v9  ;;  %677 = vmatpush3.bf16.msra.mxu0 %v767_v28  ;;  %p796_p2 = por %p795_p1, %p794_p0 }
  0x1d   : > { %699 = vmatpush3.bf16.msra.mxu1 %v768_v29  ;;  %678 = vmatprep.subr.bf16.mxu0 %v769_v30 }
  0x1e   : > { %v176_v15 = vadd.f32 %v175_v12, %v943_v7  ;;  %v186_v16 = vadd.f32 %v185_v14, %v183_v11  ;;  %700 = vmatprep.subr.bf16.mxu1 %v770_v31  ;;  %p797_p3 = pnand %p796_p2, %p790_p13 }
  0x20   : > { %177 = vadd.xlane.f32.xlu0 %v176_v15  ;;  %v187_v17 = vadd.f32 %v186_v16, %v184_v13  ;;  %679 = vmatpush3.bf16.msra.mxu0 %v771_v32 }
  0x21   : > { %701 = vmatpush3.bf16.msra.mxu1 %v772_v33  ;;  %680 = vmatprep.subr.bf16.mxu0 %v773_v34 }
  0x22   : > { %702 = vmatprep.subr.bf16.mxu1 %v774_v35 }
  0x24   : > { %188 = vadd.xlane.f32.xlu0 %v187_v17  ;;  %681 = vmatpush3.bf16.msra.mxu0 %v775_v36 }
  0x25   : > { %703 = vmatpush3.bf16.msra.mxu1 %v776_v37  ;;  %682 = vmatprep.subr.bf16.mxu0 %v777_v38 }
  0x26   : > { %704 = vmatprep.subr.bf16.mxu1 %v778_v39 }
  0x28   : > { %683 = vmatpush3.bf16.msra.mxu0 %v779_v40 }
  0x29   : > { %705 = vmatpush3.bf16.msra.mxu1 %v780_v41  ;;  %684 = vmatprep.subr.bf16.mxu0 %v781_v42 }
  0x2a   : > { %706 = vmatprep.subr.bf16.mxu1 %v782_v43 }
  0x2c   : > { %685 = vmatpush3.bf16.msra.mxu0 %v783_v44 }
  0x2d   : > { %707 = vmatpush3.bf16.msra.mxu1 %v784_v45 }
  0xad   : > { %v178_v46 = vpop.xlane.xlu0 %177 }
  0xae   : > { %v180_v47 = vmul.f32 0.001953125, %v178_v46 }
  0xb0   : > { %v191_v49 = vmul.f32 %v180_v47, %v180_v47  ;;  %v195_v54 = vsub.f32 %v939_v5, %v180_v47  ;;  %v197_v55 = vsub.f32 %v943_v7, %v180_v47  ;;  %v194_v56 = vsub.f32 %v937_v4, %v180_v47  ;;  %v632_v5 = vld [vmem:[%s1097_s2] ss:$0 sm:$0xff] }
  0xb1   : > { %v189_v48 = vpop.xlane.xlu0 %188  ;;  %v196_v57 = vsub.f32 %v941_v6, %v180_v47 }
  0xb2   : > { %v190_v50 = vmul.f32 0.001953125, %v189_v48 }
  0xb4   : > { %v192_v51 = vsub.f32 %v190_v50, %v191_v49 }
  0xb6   : > { %v193_v52 = vmax.f32 %v192_v51, 0.0 }
  0xb8   : > { %v198_v53 = vadd.f32 1e-05, %v193_v52 }
  0xba   : > { %785 = vrsqrt.f32 %v198_v53 }
  0xc4   : > { %v786_v58 = vpop.eup %785 }
  0xc5   : > { %v201_v59 = vmul.f32 %v786_v58, %v195_v54  ;;  %v203_v60 = vmul.f32 %v786_v58, %v197_v55  ;;  %v200_v61 = vmul.f32 %v786_v58, %v194_v56  ;;  %v202_v62 = vmul.f32 %v786_v58, %v196_v57 }
  0xc7   : > { %v269_v63 = vpack.c.bf16 %v201_v59, %v201_v59  ;;  %v271_v0 = vpack.c.bf16 %v203_v60, %v203_v60  ;;  %v268_v1 = vpack.c.bf16 %v200_v61, %v200_v61  ;;  %v270_v2 = vpack.c.bf16 %v202_v62, %v202_v62 }
  0xc9   : > { %503 = vmatprep.mubr.bf16.mxu0 %v269_v63  ;;  %543 = vmatprep.mubr.bf16.mxu1 %v271_v0 }
  0xca   : > { %504 = vmatmul.mubr.bf16.vlgmr.msra.gmra.mrb[0].mxu0 %v268_v1  ;;  %544 = vmatmul.mubr.bf16.vlgmr.msra.gmra.mrb[0].mxu1 %v270_v2 }
 0x19d   : > { %v686_v3 = vpop.f32.mrb[0].mxu0  ;;  %v708_v4 = vpop.f32.mrb[0].mxu1 }
 0x19e   : > { %v687_v6 = vpop.f32.mrb[1].mxu0  ;;  %v709_v7 = vpop.f32.mrb[1].mxu1 }
 0x19f   : > { %v688_v8 = vadd.f32 %v687_v6, %v686_v3  ;;  %v710_v9 = vadd.f32 %v709_v7, %v708_v4  ;;  %v689_v10 = vpop.f32.mrb[2].mxu0  ;;  %v711_v11 = vpop.f32.mrb[2].mxu1 }
 0x1a0   : > { %v690_v12 = vpop.f32.mrb[3].mxu0  ;;  %v712_v13 = vpop.f32.mrb[3].mxu1 }
 0x1a1   : > { %v506_v14 = vadd.f32 %v688_v8, %v632_v5 }
 0x1a3   : > { %v546_v15 = vadd.f32 %v710_v9, %v506_v14 }
 0x1a5   : > { %551 = vst [vmem:[%s163_s26] sm:$0xff] %v546_v15 }
 0x1a6   : > { %800 = shalt.err (!%p797_p3)
}
 0x1a7   : > { %s801_s8 = scalar_lea.hbm %s1053_s30, 128  ;;  %s805_s11 = scalar_lea.hbm %s1098_s3, 256 }
 0x1a8   : > { %p802_p4 = scmp.ne.s32.totalorder %s1053_s30, %s801_s8  ;;  %p806_p9 = scmp.lt.u32.totalorder %s1053_s30, %s1098_s3 }
 0x1a9   : > { %p807_p10 = scmp.lt.u32.totalorder %s805_s11, %s801_s8  ;;  %p809_p12 = scmp.lt.u32.totalorder %s801_s8, %s1053_s30 }
 0x1aa   : > { %p803_p7 = pnand %p802_p4, %p910_p5 }
 0x1ab   : > { %p808_p11 = por %p807_p10, %p806_p9 }
 0x1ac   : > { %p804_p8 = pneg %p803_p7 }
 0x1ad   : > { %p810_p13 = por %p809_p12, %p808_p11 }
 0x1af   : > { %p811_p0 = pnand %p810_p13, %p804_p8 }
 0x1b1   : > { %814 = shalt.err (!%p811_p0)
}
 0x1b2   : > { %714 = dma.vmem_to_hbm [thread:$0]  (%p910_p5), %s1055_s27, 128, %s1053_s30, %s553_s4  }
 0x1b3 PF: > { %p720_p1 = scmp.ge.s32.totalorder %s849_s15, 2  ;;  %s578_s20 = sand.u32 1, %s837_s12  }
 0x1b4   : > { %s579_s24 = scalar_lea.sflag [#allocation3], %s578_s20 }
 0x1b5   : > { %p717_p2 = pnand %p720_p1, %p914_p6 }
 0x1b7   : > { %832 = dma.done.wait (!%p717_p2), %s579_s24, 128  }
 0x1b8   : > { %834 = vsyncadd (!%p717_p2), %s579_s24, 4294967168  ;;  %p13_p3 = scmp.ge.s32.totalorder %s897_s18, 4   ;;  %s1101_s12 = smov %s841_s13 }
 0x1b9   : > { %s1102_s13 = smov %s845_s14  ;;  %s1103_s14 = smov %s908_s21 }
 0x1ba   : > { %s1104_s15 = smov %s897_s18  ;;  %15 = sbr.rel (!%p13_p3) target bundleno = 3 (0x3), region = 67 }
 0x1c1   :  { %584 = vsyncpa [#allocation3], 1 }
 0x1c2   :  { %586 = vsyncpa [#allocation3 + $0x1], 1 }

</bundles_post_ra>
